<compile_context>
chip_gen: v7x
topology: tpu7x:2x2x1
jax: 0.10.0
libtpu: 0.0.40
codegen_flags: <defaults>
</compile_context>

<pallas_src>
import functools

import jax
import jax.numpy as jnp
from jax.experimental import pallas as pl
from jax.experimental.pallas import tpu as pltpu

LANES = 128
SUBLANES = 8
MAX_TILE_ROWS = 1024  # rows of 128 lanes per grid step (512 KiB f32 per input)


def _wmape_kernel(has_w, rows_ref, *refs):
    """Accumulate sum(|yp - yt| [* w]) and sum(|yt|) across the grid."""
    if has_w:
        yp_ref, yt_ref, w_ref, num_ref, den_ref, acc_num, acc_den = refs
    else:
        yp_ref, yt_ref, num_ref, den_ref, acc_num, acc_den = refs
        w_ref = None

    i = pl.program_id(0)

    @pl.when(i == 0)
    def _():
        acc_num[...] = jnp.zeros_like(acc_num)
        acc_den[...] = jnp.zeros_like(acc_den)

    tile_rows = yp_ref.shape[0]
    # Mask rows that fall beyond the real data (ragged last block).
    row_idx = jax.lax.broadcasted_iota(jnp.int32, (tile_rows, LANES), 0)
    valid = (row_idx + i * tile_rows) < rows_ref[0]

    yp = yp_ref[...].astype(jnp.float32)
    yt = yt_ref[...].astype(jnp.float32)

    num_term = jnp.abs(yp - yt)
    if has_w:
        num_term = num_term * w_ref[...].astype(jnp.float32)
    num_term = jnp.where(valid, num_term, 0.0)
    den_term = jnp.where(valid, jnp.abs(yt), 0.0)

    # Fold (tile_rows, 128) into the (8, 128) accumulators with VPU adds only.
    acc_num[...] += num_term.reshape(-1, SUBLANES, LANES).sum(axis=0)
    acc_den[...] += den_term.reshape(-1, SUBLANES, LANES).sum(axis=0)

    @pl.when(i == pl.num_programs(0) - 1)
    def _():
        num_ref[...] = jnp.sum(acc_num[...], keepdims=True)
        den_ref[...] = jnp.sum(acc_den[...], keepdims=True)


def _to_slab(x):
    """Reshape to a lane-dense (R, 128) slab; pads only if size % 128 != 0."""
    flat = x.reshape(-1)
    pad = (-flat.shape[0]) % LANES
    if pad:
        flat = jnp.pad(flat, (0, pad))  # zeros: contribute 0 to both sums
    return flat.reshape(flat.shape[0] // LANES, LANES)


def wmape(y_pred, y_true, weights, eps=1e-9):
    n_elems = y_true.size  # real element count, for the elementwise-eps term

    w = jnp.asarray(weights)
    scalar_w = w.size == 1

    yp2 = _to_slab(y_pred)
    yt2 = _to_slab(y_true)
    inputs = [yp2, yt2]
    if not scalar_w:
        if w.shape != y_true.shape:
            w = jnp.broadcast_to(w, y_true.shape)
        inputs.append(_to_slab(w))

    rows = yp2.shape[0]
    tile_rows = min(MAX_TILE_ROWS, ((rows + SUBLANES - 1) // SUBLANES) * SUBLANES)
    grid = (pl.cdiv(rows, tile_rows),)

    tile_spec = pl.BlockSpec((tile_rows, LANES), lambda i, r: (i, 0))
    out_spec = pl.BlockSpec((1, 1), lambda i, r: (0, 0))

    num, den_base = pl.pallas_call(
        functools.partial(_wmape_kernel, not scalar_w),
        out_shape=(
            jax.ShapeDtypeStruct((1, 1), jnp.float32),
            jax.ShapeDtypeStruct((1, 1), jnp.float32),
        ),
        grid_spec=pltpu.PrefetchScalarGridSpec(
            num_scalar_prefetch=1,
            grid=grid,
            in_specs=[tile_spec] * len(inputs),
            out_specs=[out_spec, out_spec],
            scratch_shapes=[
                pltpu.VMEM((SUBLANES, LANES), jnp.float32),
                pltpu.VMEM((SUBLANES, LANES), jnp.float32),
            ],
        ),
        compiler_params=pltpu.CompilerParams(
            dimension_semantics=("arbitrary",)
        ),
    )(jnp.array([rows], dtype=jnp.int32), *inputs)

    num_s = num[0, 0]
    if scalar_w:
        num_s = num_s * w.reshape(()).astype(jnp.float32)
    den = den_base[0, 0] + jnp.float32(eps) * jnp.float32(n_elems)
    return num_s / den


def _ref_wmape(y_pred, y_true, weights, eps=1e-9):
    return (jnp.abs(y_pred - y_true) * weights).sum() / (eps + jnp.abs(y_true)).sum()


if __name__ == "__main__":
    key = jax.random.PRNGKey(0)
    k1, k2, k3 = jax.random.split(key, 3)

    # Small NCHW-like inputs (main case: per-element weights, size % 128 == 0).
    shape = (2, 4, 16, 16)
    y_pred = jax.random.normal(k1, shape, dtype=jnp.float32)
    y_true = jax.random.normal(k2, shape, dtype=jnp.float32)
    weights = jax.random.uniform(k3, shape, dtype=jnp.float32, minval=0.5, maxval=1.5)

    out = wmape(y_pred, y_true, weights)
    jax.block_until_ready(out)
    ref = _ref_wmape(y_pred, y_true, weights)
    assert jnp.allclose(out, ref, rtol=1e-5, atol=1e-6), (out, ref)

    # Ragged case: element count not a multiple of 128 (in-kernel row masking).
    shape2 = (2, 3, 9, 11)
    yp2 = jax.random.normal(k1, shape2, dtype=jnp.float32)
    yt2 = jax.random.normal(k2, shape2, dtype=jnp.float32)
    w2 = jax.random.uniform(k3, shape2, dtype=jnp.float32, minval=0.5, maxval=1.5)
    out2 = wmape(yp2, yt2, w2)
    jax.block_until_ready(out2)
    ref2 = _ref_wmape(yp2, yt2, w2)
    assert jnp.allclose(out2, ref2, rtol=1e-5, atol=1e-6), (out2, ref2)

    # Multi-step grid + ragged last block (R=1600 rows, tile_rows=1024).
    shape3 = (2, 4, 128, 200)
    yp3 = jax.random.normal(k1, shape3, dtype=jnp.float32)
    yt3 = jax.random.normal(k2, shape3, dtype=jnp.float32)
    w3 = jax.random.uniform(k3, shape3, dtype=jnp.float32, minval=0.5, maxval=1.5)
    out3 = wmape(yp3, yt3, w3)
    jax.block_until_ready(out3)
    ref3 = _ref_wmape(yp3, yt3, w3)
    assert jnp.allclose(out3, ref3, rtol=1e-4, atol=1e-6), (out3, ref3)

    # Scalar-weight path (weight folded into glue, only 2 HBM streams).
    out_sw = wmape(y_pred, y_true, 0.75)
    jax.block_until_ready(out_sw)
    ref_sw = _ref_wmape(y_pred, y_true, 0.75)
    assert jnp.allclose(out_sw, ref_sw, rtol=1e-5, atol=1e-6), (out_sw, ref_sw)

    print("KERNEL_OK")
</pallas_src>

<mosaic_0001>
module attributes {stable_mosaic.version = 11 : i64} {
  func.func @_wmape_kernel(%arg0: i32, %arg1: memref<1xi32, #tpu.memory_space<smem>>, %arg2: memref<16x128xf32, #tpu.memory_space<vmem>>, %arg3: memref<16x128xf32, #tpu.memory_space<vmem>>, %arg4: memref<16x128xf32, #tpu.memory_space<vmem>>, %arg5: memref<1x1xf32, #tpu.memory_space<vmem>>, %arg6: memref<1x1xf32, #tpu.memory_space<vmem>>, %arg7: memref<8x128xf32, #tpu.memory_space<vmem>>, %arg8: memref<8x128xf32, #tpu.memory_space<vmem>>) attributes {dimension_semantics = [#tpu.dimension_semantics<arbitrary>], iteration_bounds = array<i64: 1>, scalar_prefetch = 1 : i64, scratch_operands = 2 : i64, tpu.core_type = #tpu.core_type<tc>, window_params = [{transform_indices = @transform_0, window_bounds = array<i64: 16, 128>}, {transform_indices = @transform_1, window_bounds = array<i64: 16, 128>}, {transform_indices = @transform_2, window_bounds = array<i64: 16, 128>}, {pipeline_mode = #tpu.pipeline_mode<synchronous>, transform_indices = @transform_3, window_bounds = array<i64: 1, 1>}, {pipeline_mode = #tpu.pipeline_mode<synchronous>, transform_indices = @transform_4, window_bounds = array<i64: 1, 1>}]} {
    %c0_i32 = arith.constant 0 : i32
    %0 = arith.cmpi eq, %arg0, %c0_i32 : i32
    %1 = arith.extui %0 : i1 to i32
    %c0_i32_0 = arith.constant 0 : i32
    %2 = arith.cmpi ne, %1, %c0_i32_0 : i32
    scf.if %2 {
      %cst_20 = arith.constant 0.000000e+00 : f32
      %34 = vector.broadcast %cst_20 : f32 to vector<8x128xf32>
      %c0_21 = arith.constant 0 : index
      %c0_22 = arith.constant 0 : index
      %35 = vector.load %arg7[%c0_21, %c0_22] : memref<8x128xf32, #tpu.memory_space<vmem>>, vector<8x128xf32>
      tpu.vector_store %arg7[%c0_21, %c0_22], %34 {strides = array<i32>} : memref<8x128xf32, #tpu.memory_space<vmem>>, vector<8x128xf32>,
      %cst_23 = arith.constant 0.000000e+00 : f32
      %36 = vector.broadcast %cst_23 : f32 to vector<8x128xf32>
      %c0_24 = arith.constant 0 : index
      %c0_25 = arith.constant 0 : index
      %37 = vector.load %arg8[%c0_24, %c0_25] : memref<8x128xf32, #tpu.memory_space<vmem>>, vector<8x128xf32>
      tpu.vector_store %arg8[%c0_24, %c0_25], %36 {strides = array<i32>} : memref<8x128xf32, #tpu.memory_space<vmem>>, vector<8x128xf32>,
    } else {
    }
    %3 = tpu.iota {dimensions = array<i32: 0>} : vector<16x128xi32>
    %c16_i32 = arith.constant 16 : i32
    %4 = arith.muli %arg0, %c16_i32 : i32
    %5 = vector.broadcast %4 : i32 to vector<16x128xi32>
    %6 = arith.addi %3, %5 : vector<16x128xi32>
    %c0 = arith.constant 0 : index
    %7 = memref.load %arg1[%c0] : memref<1xi32, #tpu.memory_space<smem>>
    %8 = vector.broadcast %7 : i32 to vector<16x128xi32>
    %9 = arith.cmpi slt, %6, %8 : vector<16x128xi32>
    %c0_1 = arith.constant 0 : index
    %c0_2 = arith.constant 0 : index
    %10 = vector.load %arg2[%c0_1, %c0_2] : memref<16x128xf32, #tpu.memory_space<vmem>>, vector<16x128xf32>
    %c0_3 = arith.constant 0 : index
    %c0_4 = arith.constant 0 : index
    %11 = vector.load %arg3[%c0_3, %c0_4] : memref<16x128xf32, #tpu.memory_space<vmem>>, vector<16x128xf32>
    %12 = arith.subf %10, %11 : vector<16x128xf32>
    %13 = math.absf %12 : vector<16x128xf32>
    %c0_5 = arith.constant 0 : index
    %c0_6 = arith.constant 0 : index
    %14 = vector.load %arg4[%c0_5, %c0_6] : memref<16x128xf32, #tpu.memory_space<vmem>>, vector<16x128xf32>
    %15 = arith.mulf %13, %14 : vector<16x128xf32>
    %cst = arith.constant 0.000000e+00 : f32
    %16 = vector.broadcast %cst : f32 to vector<16x128xf32>
    %17 = arith.select %9, %15, %16 : vector<16x128xi1>, vector<16x128xf32>
    %18 = math.absf %11 : vector<16x128xf32>
    %cst_7 = arith.constant 0.000000e+00 : f32
    %19 = vector.broadcast %cst_7 : f32 to vector<16x128xf32>
    %20 = arith.select %9, %18, %19 : vector<16x128xi1>, vector<16x128xf32>
    %c0_8 = arith.constant 0 : index
    %c0_9 = arith.constant 0 : index
    %21 = vector.load %arg7[%c0_8, %c0_9] : memref<8x128xf32, #tpu.memory_space<vmem>>, vector<8x128xf32>
    %22 = vector.shape_cast %17 : vector<16x128xf32> to vector<2x8x128xf32>
    %cst_10 = arith.constant dense<0.000000e+00> : vector<8x128xf32>
    %23 = vector.multi_reduction <add>, %22, %cst_10 [0] : vector<2x8x128xf32> to vector<8x128xf32>
    %24 = arith.addf %21, %23 : vector<8x128xf32>
    %c0_11 = arith.constant 0 : index
    %c0_12 = arith.constant 0 : index
    %25 = vector.load %arg7[%c0_11, %c0_12] : memref<8x128xf32, #tpu.memory_space<vmem>>, vector<8x128xf32>
    tpu.vector_store %arg7[%c0_11, %c0_12], %24 {strides = array<i32>} : memref<8x128xf32, #tpu.memory_space<vmem>>, vector<8x128xf32>,
    %c0_13 = arith.constant 0 : index
    %c0_14 = arith.constant 0 : index
    %26 = vector.load %arg8[%c0_13, %c0_14] : memref<8x128xf32, #tpu.memory_space<vmem>>, vector<8x128xf32>
    %27 = vector.shape_cast %20 : vector<16x128xf32> to vector<2x8x128xf32>
    %cst_15 = arith.constant dense<0.000000e+00> : vector<8x128xf32>
    %28 = vector.multi_reduction <add>, %27, %cst_15 [0] : vector<2x8x128xf32> to vector<8x128xf32>
    %29 = arith.addf %26, %28 : vector<8x128xf32>
    %c0_16 = arith.constant 0 : index
    %c0_17 = arith.constant 0 : index
    %30 = vector.load %arg8[%c0_16, %c0_17] : memref<8x128xf32, #tpu.memory_space<vmem>>, vector<8x128xf32>
    tpu.vector_store %arg8[%c0_16, %c0_17], %29 {strides = array<i32>} : memref<8x128xf32, #tpu.memory_space<vmem>>, vector<8x128xf32>,
    %c0_i32_18 = arith.constant 0 : i32
    %31 = arith.cmpi eq, %arg0, %c0_i32_18 : i32
    %32 = arith.extui %31 : i1 to i32
    %c0_i32_19 = arith.constant 0 : i32
    %33 = arith.cmpi ne, %32, %c0_i32_19 : i32
    scf.if %33 {
      %c0_20 = arith.constant 0 : index
      %c0_21 = arith.constant 0 : index
      %34 = vector.load %arg7[%c0_20, %c0_21] : memref<8x128xf32, #tpu.memory_space<vmem>>, vector<8x128xf32>
      %35 = vector.shape_cast %34 : vector<8x128xf32> to vector<1x8x128xf32>
      %cst_22 = arith.constant dense<0.000000e+00> : vector<1xf32>
      %36 = vector.multi_reduction <add>, %35, %cst_22 [1, 2] : vector<1x8x128xf32> to vector<1xf32>
      %37 = vector.shape_cast %36 : vector<1xf32> to vector<1x1x1xf32>
      %38 = vector.extract %37[0, 0, 0] : f32 from vector<1x1x1xf32>
      %39 = vector.broadcast %38 : f32 to vector<1x1xf32>
      %c0_23 = arith.constant 0 : index
      %c0_24 = arith.constant 0 : index
      %40 = vector.load %arg5[%c0_23, %c0_24] : memref<1x1xf32, #tpu.memory_space<vmem>>, vector<1x1xf32>
      tpu.vector_store %arg5[%c0_23, %c0_24], %39 {strides = array<i32>} : memref<1x1xf32, #tpu.memory_space<vmem>>, vector<1x1xf32>,
      %c0_25 = arith.constant 0 : index
      %c0_26 = arith.constant 0 : index
      %41 = vector.load %arg8[%c0_25, %c0_26] : memref<8x128xf32, #tpu.memory_space<vmem>>, vector<8x128xf32>
      %42 = vector.shape_cast %41 : vector<8x128xf32> to vector<1x8x128xf32>
      %cst_27 = arith.constant dense<0.000000e+00> : vector<1xf32>
      %43 = vector.multi_reduction <add>, %42, %cst_27 [1, 2] : vector<1x8x128xf32> to vector<1xf32>
      %44 = vector.shape_cast %43 : vector<1xf32> to vector<1x1x1xf32>
      %45 = vector.extract %44[0, 0, 0] : f32 from vector<1x1x1xf32>
      %46 = vector.broadcast %45 : f32 to vector<1x1xf32>
      %c0_28 = arith.constant 0 : index
      %c0_29 = arith.constant 0 : index
      %47 = vector.load %arg6[%c0_28, %c0_29] : memref<1x1xf32, #tpu.memory_space<vmem>>, vector<1x1xf32>
      tpu.vector_store %arg6[%c0_28, %c0_29], %46 {strides = array<i32>} : memref<1x1xf32, #tpu.memory_space<vmem>>, vector<1x1xf32>,
    } else {
    }
    return
  }
  func.func @transform_0(%arg0: i32, %arg1: memref<1xi32, #tpu.memory_space<smem>>) -> (i32, i32) {
    %c0_i32 = arith.constant 0 : i32
    %c0_i32_0 = arith.constant 0 : i32
    return %arg0, %c0_i32 : i32, i32
  }
  func.func @transform_1(%arg0: i32, %arg1: memref<1xi32, #tpu.memory_space<smem>>) -> (i32, i32) {
    %c0_i32 = arith.constant 0 : i32
    %c0_i32_0 = arith.constant 0 : i32
    return %arg0, %c0_i32 : i32, i32
  }
  func.func @transform_2(%arg0: i32, %arg1: memref<1xi32, #tpu.memory_space<smem>>) -> (i32, i32) {
    %c0_i32 = arith.constant 0 : i32
    %c0_i32_0 = arith.constant 0 : i32
    return %arg0, %c0_i32 : i32, i32
  }
  func.func @transform_3(%arg0: i32, %arg1: memref<1xi32, #tpu.memory_space<smem>>) -> (i32, i32) {
    %c0_i32 = arith.constant 0 : i32
    %c0_i32_0 = arith.constant 0 : i32
    %c0_i32_1 = arith.constant 0 : i32
    return %c0_i32, %c0_i32_0 : i32, i32
  }
  func.func @transform_4(%arg0: i32, %arg1: memref<1xi32, #tpu.memory_space<smem>>) -> (i32, i32) {
    %c0_i32 = arith.constant 0 : i32
    %c0_i32_0 = arith.constant 0 : i32
    %c0_i32_1 = arith.constant 0 : i32
    return %c0_i32, %c0_i32_0 : i32, i32
  }
}

</mosaic_0001>

<bundles_post_ra>
// kernel: tpu_custom_call.1
= control target key start
LH: loop header
LB: loop body
LE: loop exit
PB: predicated region body
PF: predicated region fallthrough
CT: control target
= control target key end

     0   :  { %12 = vsyncpa [#allocation7], 0  ;;  %s409_s0 = inlined_call_operand.<no memory space> [shape: s32[1], index: 0, kind: input, shape index: {}]   ;;  %s410_s1 = inlined_call_operand.hbm [shape: f32[16,128], index: 1, kind: input, shape index: {}]   ;;  %s411_s2 = inlined_call_operand.hbm [shape: f32[16,128], index: 2, kind: input, shape index: {}]   ;;  %s412_s3 = inlined_call_operand.hbm [shape: f32[16,128], index: 3, kind: input, shape index: {}]   ;;  %s413_s4 = inlined_call_operand.hbm [shape: f32[1,1], index: 4, kind: output, shape index: {0}]   ;;  %s414_s5 = inlined_call_operand.hbm [shape: f32[1,1], index: 5, kind: output, shape index: {1}]  }
   0x1   :  { %13 = vsyncpa [#allocation10], 0 }
   0x2   :  { %14 = vsyncpa [#allocation8], 0 }
   0x3   :  { %15 = vsyncpa [#allocation14], 0  ;;  %s291_s18 = smov [#allocation9]   ;;  %s292_s20 = smov [#allocation6]  }
   0x4   :  { %s33_s19 = sshll.u32 %s291_s18, 4  ;;  %s21_s21 = sshll.u32 %s292_s20, 4  ;;  %s34_s19 = int_to_ptr.vmem [resolvable:$true] %s33_s19  ;;  %s328_s21 = int_to_ptr.vmem [resolvable:$true] %s21_s21 }
   0x5   :  { %s173_s24 = scalar_lea.hbm %s411_s2, 256 }
   0x6   :  { %p174_p0 = scmp.ne.s32.totalorder %s411_s2, %s173_s24  ;;  %p177_p1 = scmp.lt.u32.totalorder %s173_s24, %s411_s2 }
   0x8   :  { %p179_p2 = pnand %p177_p1, %p174_p0 }
   0xa   :  { %182 = shalt.err (!%p179_p2)
}
   0xb   :  { %s183_s29 = scalar_lea.vmem %s34_s19, 256  ;;  %p188_p4 = scmp.lt.s32.totalorder %s34_s19, %s34_s19 }
   0xc   :  { %p184_p3 = scmp.ne.s32.totalorder %s34_s19, %s183_s29  ;;  %p189_p5 = scmp.lt.s32.totalorder %s183_s29, %s183_s29 }
   0xe   :  { %p190_p6 = por %p189_p5, %p188_p4 }
  0x10   :  { %p191_p7 = pnand %p190_p6, %p184_p3 }
  0x12   :  { %194 = shalt.err (!%p191_p7)
}
  0x13   :  { %s293_s30 = smov 128   ;;  %s294_s6 = smov 8  }
  0x14   :  { %39 = dma.hbm_to_vmem [thread:$0]  %s411_s2, 256, %s34_s19, [#allocation10], %s293_s30, %s293_s30, %s294_s6  }
  0x15   :  { %s195_s11 = scalar_lea.hbm %s410_s1, 256 }
  0x16   :  { %p196_p8 = scmp.ne.s32.totalorder %s410_s1, %s195_s11  ;;  %p199_p9 = scmp.lt.u32.totalorder %s195_s11, %s410_s1 }
  0x18   :  { %p201_p10 = pnand %p199_p9, %p196_p8 }
  0x1a   :  { %204 = shalt.err (!%p201_p10)
}
  0x1b   :  { %s205_s16 = scalar_lea.vmem %s328_s21, 256  ;;  %p210_p12 = scmp.lt.s32.totalorder %s328_s21, %s328_s21 }
  0x1c   :  { %p206_p11 = scmp.ne.s32.totalorder %s328_s21, %s205_s16  ;;  %p211_p13 = scmp.lt.s32.totalorder %s205_s16, %s205_s16 }
  0x1e   :  { %p212_p0 = por %p211_p13, %p210_p12 }
  0x20   :  { %p213_p1 = pnand %p212_p0, %p206_p11 }
  0x22   :  { %216 = shalt.err (!%p213_p1)
}
  0x23   :  { %27 = dma.hbm_to_vmem [thread:$0]  %s410_s1, 256, %s328_s21, [#allocation7], %s293_s30, %s293_s30, %s294_s6  }
  0x24   :  { %s295_s18 = smov [#allocation11]   ;;  %s217_s23 = scalar_lea.hbm %s412_s3, 256 }
  0x25   :  { %s45_s19 = sshll.u32 %s295_s18, 4  ;;  %p218_p2 = scmp.ne.s32.totalorder %s412_s3, %s217_s23  ;;  %s46_s19 = int_to_ptr.vmem [resolvable:$true] %s45_s19 }
  0x26   :  { %p221_p3 = scmp.lt.u32.totalorder %s217_s23, %s412_s3 }
  0x28   :  { %p223_p4 = pnand %p221_p3, %p218_p2 }
  0x2a   :  { %226 = shalt.err (!%p223_p4)
}
  0x2b   :  { %s227_s28 = scalar_lea.vmem %s46_s19, 256  ;;  %p232_p6 = scmp.lt.s32.totalorder %s46_s19, %s46_s19 }
  0x2c   :  { %p228_p5 = scmp.ne.s32.totalorder %s46_s19, %s227_s28  ;;  %p233_p7 = scmp.lt.s32.totalorder %s227_s28, %s227_s28 }
  0x2e   :  { %p234_p8 = por %p233_p7, %p232_p6 }
  0x30   :  { %p235_p9 = pnand %p234_p8, %p228_p5 }
  0x32   :  { %238 = shalt.err (!%p235_p9)
}
  0x33   :  { %51 = dma.hbm_to_vmem [thread:$0]  %s412_s3, 256, %s46_s19, [#allocation10], %s293_s30, %s293_s30, %s294_s6  }
  0x34   :  { %283 = dma.done.wait [#allocation7], 256  }
  0x35   :  { %284 = vsyncadd [#allocation7], 4294967040 }
  0x36   :  { %285 = dma.done.wait [#allocation10], 512  }
  0x37   :  { %286 = vsyncadd [#allocation10], 4294966784  ;;  %v67_v0 = vlaneseq  ;;  %v78_v2 = vld [vmem:[#allocation6] sm:$0xff]  ;;  %v79_v3 = vld [vmem:[#allocation6 + $0x8] sm:$0xff]  ;;  %v75_v6 = vstv %s409_s0  ;;  %s296_s0 = smov [#allocation12]   ;;  %vm118_vm2 = vcmask 0  }
  0x38   :  { %v80_v4 = vld [vmem:[#allocation9] sm:$0xff]  ;;  %v81_v7 = vld [vmem:[#allocation9 + $0x8] sm:$0xff]  ;;  %v86_v10 = vld [vmem:[#allocation11] sm:$0xff]  ;;  %s138_s3 = sshll.u32 %s296_s0, 4  ;;  %s297_s6 = smov [#allocation13]   ;;  %s139_s3 = int_to_ptr.vmem [resolvable:$true] %s138_s3 }
  0x39   :  { %v68_v1 = vshrl.u32 %v67_v0, 7  ;;  %v82_v8 = vsub.f32 %v78_v2, %v80_v4  ;;  %v83_v9 = vsub.f32 %v79_v3, %v81_v7  ;;  %v87_v12 = vld [vmem:[#allocation11 + $0x8] sm:$0xff]  ;;  %v92_v14 = vand.u32 2147483647, %v80_v4  ;;  %s148_s8 = sshll.u32 %s297_s6, 4  ;;  %s239_s9 = scalar_lea.vmem %s139_s3, 16  ;;  %s149_s8 = int_to_ptr.vmem [resolvable:$true] %s148_s8 }
  0x3a   :  { %v93_v15 = vand.u32 2147483647, %v81_v7  ;;  %p240_p10 = scmp.ne.s32.totalorder %s139_s3, %s239_s9  ;;  %s243_s10 = scalar_lea.vmem %s139_s3, 32 }
  0x3b   :  { %v69_v5 = vadd.s32 8, %v68_v1  ;;  %v84_v11 = vand.u32 2147483647, %v82_v8  ;;  %vm76_vm0 = vcmp.lt.s32.totalorder %v68_v1, %v75_v6  ;;  %v85_v13 = vand.u32 2147483647, %v83_v9  ;;  %p244_p11 = scmp.lt.s32.totalorder %s139_s3, %s139_s3  ;;  %p245_p12 = scmp.lt.s32.totalorder %s243_s10, %s239_s9 }
  0x3c   :  { %v94_v20 = vsel %vm76_vm0, %v92_v14, 0.0 }
  0x3d   :  { %vm77_vm1 = vcmp.lt.s32.totalorder %v69_v5, %v75_v6  ;;  %v88_v16 = vmul.f32 %v86_v10, %v84_v11  ;;  %v89_v17 = vmul.f32 %v87_v12, %v85_v13  ;;  %p246_p13 = por %p245_p12, %p244_p11 }
  0x3e   :  { %v95_v21 = vsel %vm77_vm1, %v93_v15, 0.0 }
  0x3f   :  { %v90_v18 = vsel %vm76_vm0, %v88_v16, 0.0  ;;  %v91_v19 = vsel %vm77_vm1, %v89_v17, 0.0  ;;  %v101_v23 = vadd.f32 %v95_v21, %v94_v20  ;;  %p247_p0 = pnand %p246_p13, %p240_p10 }
  0x40   :  { %v97_v22 = vadd.f32 %v91_v19, %v90_v18 }
  0x42   :  { %108 = vadd.xlane.f32.xlu0 %v97_v22 }
  0x46   :  { %121 = vadd.xlane.f32.xlu0 %v101_v23 }
  0xcf   :  { %v109_v24 = vpop.xlane.xlu0 %108 }
  0xd0   :  { %v110_v25 = vrot.slane %v109_v24, 4 }
  0xd2   :  { %v111_v26 = vadd.f32 %v110_v25, %v109_v24 }
  0xd3   :  { %v122_v27 = vpop.xlane.xlu0 %121 }
  0xd4   :  { %v112_v28 = vrot.slane %v111_v26, 2  ;;  %v123_v29 = vrot.slane %v122_v27, 4 }
  0xd6   :  { %v124_v30 = vadd.f32 %v123_v29, %v122_v27  ;;  %v113_v31 = vadd.f32 %v112_v28, %v111_v26 }
  0xd8   :  { %v125_v32 = vrot.slane %v124_v30, 2  ;;  %v114_v33 = vrot.slane %v113_v31, 1 }
  0xda   :  { %v126_v34 = vadd.f32 %v125_v32, %v124_v30  ;;  %v115_v35 = vadd.f32 %v114_v33, %v113_v31 }
  0xdc   :  { %162 = vpush %v115_v35  ;;  %v127_v36 = vrot.slane %v126_v34, 1 }
  0xde   :  { %v128_v37 = vadd.f32 %v127_v36, %v126_v34 }
  0xe0   :  { %164 = vpush %v128_v37 }
 0x10d   :  { %s163_s30 = spop %162 }
 0x10e   :  { %v117_v38 = vstv %s163_s30 }
 0x10f   :  { %119 = vst.msk [vmem:[#allocation12] sm:$0x1] %vm118_vm2, %v117_v38 }
 0x110   :  { %250 = shalt.err (!%p247_p0)
}
 0x111   :  { %s251_s13 = scalar_lea.hbm %s413_s4, 16 }
 0x112   :  { %p252_p1 = scmp.ne.s32.totalorder %s413_s4, %s251_s13  ;;  %p255_p2 = scmp.lt.u32.totalorder %s251_s13, %s413_s4 }
 0x114   :  { %p257_p3 = pnand %p255_p2, %p252_p1 }
 0x116   :  { %260 = shalt.err (!%p257_p3)
}
 0x117   :  { %141 = dma.vmem_to_hbm [thread:$0]  %s139_s3, 16, %s413_s4, [#allocation8]  }
 0x118   :  { %s165_s19 = spop %164  ;;  %s261_s20 = scalar_lea.vmem %s149_s8, 16 }
 0x119   :  { %v130_v39 = vstv %s165_s19  ;;  %p262_p4 = scmp.ne.s32.totalorder %s149_s8, %s261_s20  ;;  %s265_s22 = scalar_lea.vmem %s149_s8, 32 }
 0x11a   :  { %131 = vst.msk [vmem:[#allocation13] sm:$0x1] %vm118_vm2, %v130_v39  ;;  %p266_p5 = scmp.lt.s32.totalorder %s149_s8, %s149_s8  ;;  %p267_p6 = scmp.lt.s32.totalorder %s265_s22, %s261_s20 }
 0x11c   :  { %p268_p7 = por %p267_p6, %p266_p5 }
 0x11e   :  { %p269_p8 = pnand %p268_p7, %p262_p4 }
 0x120   :  { %272 = shalt.err (!%p269_p8)
}
 0x121   :  { %s273_s25 = scalar_lea.hbm %s414_s5, 16 }
 0x122   :  { %p274_p9 = scmp.ne.s32.totalorder %s414_s5, %s273_s25  ;;  %p277_p10 = scmp.lt.u32.totalorder %s273_s25, %s414_s5 }
 0x124   :  { %p279_p11 = pnand %p277_p10, %p274_p9 }
 0x126   :  { %282 = shalt.err (!%p279_p11)
}
 0x127   :  { %151 = dma.vmem_to_hbm [thread:$0]  %s149_s8, 16, %s414_s5, [#allocation14]  }
 0x128   :  { %287 = dma.done.wait [#allocation8], 16  }
 0x129   :  { %288 = vsyncadd [#allocation8], 4294967280 }
 0x12a   :  { %289 = dma.done.wait [#allocation14], 16  }
 0x12b   :  { %290 = vsyncadd [#allocation14], 4294967280 }
 0x12c   :  { %158 = vsyncpa [#allocation7], 1 }
 0x12d   :  { %159 = vsyncpa [#allocation10], 1 }
 0x12e   :  { %160 = vsyncpa [#allocation8], 1 }
 0x12f   :  { %161 = vsyncpa [#allocation14], 1 }

</bundles_post_ra>
